<compile_context>
chip_gen: v7x
topology: tpu7x:2x2x1
jax: 0.10.0
libtpu: 0.0.40
codegen_flags: <defaults>
</compile_context>

<pallas_src>
import math
import functools

import jax
import jax.numpy as jnp
from jax.experimental import pallas as pl
from jax.experimental.pallas import tpu as pltpu


def _global_graph_kernel(vl_ref, x_ref, *wb_and_out,
                         num_layers, use_bf16_matmul):
    """All SelfAttentionFCLayer layers for one tile of batch elements."""
    o_ref = wb_and_out[-1]
    wb = wb_and_out[:-1]                     # (w0, b0, w1, b1, ...)

    x = x_ref[...].astype(jnp.float32)       # (Bt, N, C)
    Bt, N, _ = x.shape

    # valid-length masks, built once and reused across layers.
    cnt = vl_ref[...]                                              # (Bt, 1, 1)
    col_ids = jax.lax.broadcasted_iota(jnp.int32, (Bt, 1, N), 2)
    row_ids = jax.lax.broadcasted_iota(jnp.int32, (Bt, N, 1), 1)
    col_valid = col_ids < cnt                                      # (Bt, 1, N)
    row_valid = row_ids < cnt                                      # (Bt, N, 1)

    mm_dtype = jnp.bfloat16 if use_bf16_matmul else jnp.float32

    for l in range(num_layers):
        w = wb[2 * l][...]                   # (Cl, 3D)  (Q part pre-scaled)
        bias = wb[2 * l + 1][...]            # (1, 3D)
        Cl, three_d = w.shape
        D = three_d // 3

        # Fused QKV projection: one MXU matmul over the whole batch tile.
        x2 = x.reshape(Bt * N, Cl).astype(mm_dtype)
        qkv = jnp.dot(x2, w.astype(mm_dtype),
                      preferred_element_type=jnp.float32)
        qkv = (qkv + bias.astype(jnp.float32)).reshape(Bt, N, three_d)
        q = qkv[:, :, 0 * D:1 * D]           # 1/sqrt(D) already folded in
        k = qkv[:, :, 1 * D:2 * D]
        v = qkv[:, :, 2 * D:3 * D]

        # Batched Q K^T contracting the last dims (no explicit transpose).
        scores = jnp.einsum("bnd,bmd->bnm",
                            q.astype(mm_dtype), k.astype(mm_dtype),
                            preferred_element_type=jnp.float32)

        # Column mask -> -1e12 fill; softmax in f32; zero invalid rows after.
        scores = jnp.where(col_valid, scores, jnp.float32(-1e12))
        m = jnp.max(scores, axis=-1, keepdims=True)
        e = jnp.exp(scores - m)
        denom = jnp.sum(e, axis=-1, keepdims=True)
        # approx=True would move the divide to the EUP; kept exact here to
        # stay bit-close to the f32 PyTorch semantics.
        attn = e * pl.reciprocal(denom, approx=False)
        attn = jnp.where(row_valid, attn, jnp.float32(0.0))

        x = jnp.einsum("bnm,bmd->bnd",
                       attn.astype(mm_dtype), v.astype(mm_dtype),
                       preferred_element_type=jnp.float32)

    o_ref[...] = x.astype(o_ref.dtype)


def _pick_batch_tile(batch, max_tile=8):
    """Largest divisor of `batch` that is <= max_tile."""
    for bt in range(min(batch, max_tile), 0, -1):
        if batch % bt == 0:
            return bt
    return 1


def global_graph_forward(x, valid_lens, fused_params, *,
                         batch_tile=8, use_bf16_matmul=False):
    """GlobalGraph.forward as a single fused Pallas kernel.

    fused_params: list of {"wqkv": (C_l, 3D), "bqkv": (1, 3D)} per layer, with
    the 1/sqrt(D) score scale already folded into the Q columns.
    """
    # TODO(synk): valid_lens=None path (F.softmax over dim=1, no mask) and the
    # repeat_interleave branch for mismatched valid_lens are not wired through
    # the kernel; this wrapper requires a 1-D valid_lens of shape [B].
    B, N, C_in = x.shape
    num_layers = len(fused_params)
    D = fused_params[0]["wqkv"].shape[1] // 3
    Bt = _pick_batch_tile(B, batch_tile)
    grid = (B // Bt,)

    vl3 = valid_lens.astype(jnp.int32).reshape(B, 1, 1)

    in_specs = [
        pl.BlockSpec((Bt, 1, 1), lambda b: (b, 0, 0)),      # valid_lens
        pl.BlockSpec((Bt, N, C_in), lambda b: (b, 0, 0)),   # x
    ]
    operands = [vl3, x]
    for p in fused_params:
        Cl, three_d = p["wqkv"].shape
        in_specs.append(pl.BlockSpec((Cl, three_d), lambda b: (0, 0)))
        in_specs.append(pl.BlockSpec((1, three_d), lambda b: (0, 0)))
        operands.append(p["wqkv"])
        operands.append(p["bqkv"])

    kernel = functools.partial(_global_graph_kernel,
                               num_layers=num_layers,
                               use_bf16_matmul=use_bf16_matmul)

    return pl.pallas_call(
        kernel,
        out_shape=jax.ShapeDtypeStruct((B, N, D), x.dtype),
        grid_spec=pltpu.PrefetchScalarGridSpec(
            num_scalar_prefetch=0,
            grid=grid,
            in_specs=in_specs,
            out_specs=pl.BlockSpec((Bt, N, D), lambda b: (b, 0, 0)),
        ),
        compiler_params=pltpu.CompilerParams(
            dimension_semantics=("parallel",)),
    )(*operands)


def init_global_graph_params(key, in_channels, global_graph_width,
                             num_global_layers):
    """Deterministic synthetic init matching nn.Linear shapes (stored (in, out))."""
    params = []
    c = in_channels
    for _ in range(num_global_layers):
        layer = {}
        for name in ("q", "k", "v"):
            key, kw, kb = jax.random.split(key, 3)
            bound = 1.0 / math.sqrt(c)
            layer[f"w{name}"] = jax.random.uniform(
                kw, (c, global_graph_width), jnp.float32, -bound, bound)
            layer[f"b{name}"] = jax.random.uniform(
                kb, (1, global_graph_width), jnp.float32, -bound, bound)
        params.append(layer)
        c = global_graph_width
    return params


def fuse_layer_params(params):
    """One-time transform: concat Q/K/V into (C, 3D)/(1, 3D) and fold 1/sqrt(D)."""
    fused = []
    for p in params:
        d = p["wq"].shape[1]
        inv = jnp.float32(1.0 / math.sqrt(d))
        wqkv = jnp.concatenate([p["wq"] * inv, p["wk"], p["wv"]], axis=1)
        bqkv = jnp.concatenate([p["bq"] * inv, p["bk"], p["bv"]], axis=1)
        fused.append({"wqkv": wqkv, "bqkv": bqkv})
    return fused


def _ref_forward(x, valid_lens, params):
    """Pure-JAX reference of the PyTorch forward (for sanity checking)."""
    for p in params:
        q = x @ p["wq"] + p["bq"]
        k = x @ p["wk"] + p["bk"]
        v = x @ p["wv"] + p["bv"]
        scores = jnp.einsum("bnd,bmd->bnm", q, k) / math.sqrt(q.shape[-1])
        n = scores.shape[1]
        ids = jnp.arange(n)
        vl = valid_lens[:, None, None]
        mask = (ids[None, :, None] >= vl) | (ids[None, None, :] >= vl)
        s = jnp.where(mask, -1e12, scores)
        attn = jax.nn.softmax(s, axis=-1) * (1.0 - mask.astype(jnp.float32))
        x = jnp.einsum("bnm,bmd->bnd", attn, v)
    return x


if __name__ == "__main__":
    B, N = 2, 8                 # batch, num_nodes (sequence)
    in_channels = 16
    global_graph_width = 32
    num_global_layers = 2
    # need_scale only sets scale_factor_d, which is unused in forward.

    key = jax.random.PRNGKey(0)
    key, kx = jax.random.split(key)
    x = jax.random.normal(kx, (B, N, in_channels), jnp.float32)
    valid_lens = jnp.array([5, 8], dtype=jnp.int32)

    params = init_global_graph_params(key, in_channels, global_graph_width,
                                      num_global_layers)
    fused = fuse_layer_params(params)

    out = global_graph_forward(x, valid_lens, fused)
    out = jax.block_until_ready(out)

    ref = _ref_forward(x, valid_lens, params)
    assert out.shape == (B, N, global_graph_width)
    assert jnp.allclose(out, ref, atol=1e-4, rtol=1e-4), "mismatch vs reference"

    print("KERNEL_OK")
</pallas_src>

<mosaic_0001>
module attributes {stable_mosaic.version = 11 : i64} {
  func.func @_global_graph_kernel(%arg0: i32, %arg1: memref<2x1x1xi32, #tpu.memory_space<vmem>>, %arg2: memref<2x8x16xf32, #tpu.memory_space<vmem>>, %arg3: memref<16x96xf32, #tpu.memory_space<vmem>>, %arg4: memref<1x96xf32, #tpu.memory_space<vmem>>, %arg5: memref<32x96xf32, #tpu.memory_space<vmem>>, %arg6: memref<1x96xf32, #tpu.memory_space<vmem>>, %arg7: memref<2x8x32xf32, #tpu.memory_space<vmem>>) attributes {dimension_semantics = [#tpu.dimension_semantics<parallel>], iteration_bounds = array<i64: 1>, scalar_prefetch = 0 : i64, scratch_operands = 0 : i64, tpu.core_type = #tpu.core_type<tc>, window_params = [{transform_indices = @transform_0, window_bounds = array<i64: 2, 1, 1>}, {transform_indices = @transform_1, window_bounds = array<i64: 2, 8, 16>}, {pipeline_mode = #tpu.pipeline_mode<synchronous>, transform_indices = @transform_2, window_bounds = array<i64: 16, 96>}, {pipeline_mode = #tpu.pipeline_mode<synchronous>, transform_indices = @transform_3, window_bounds = array<i64: 1, 96>}, {pipeline_mode = #tpu.pipeline_mode<synchronous>, transform_indices = @transform_4, window_bounds = array<i64: 32, 96>}, {pipeline_mode = #tpu.pipeline_mode<synchronous>, transform_indices = @transform_5, window_bounds = array<i64: 1, 96>}, {transform_indices = @transform_6, window_bounds = array<i64: 2, 8, 32>}]} {
    %c0 = arith.constant 0 : index
    %c0_0 = arith.constant 0 : index
    %c0_1 = arith.constant 0 : index
    %0 = vector.load %arg2[%c0, %c0_0, %c0_1] : memref<2x8x16xf32, #tpu.memory_space<vmem>>, vector<2x8x16xf32>
    %c0_2 = arith.constant 0 : index
    %c0_3 = arith.constant 0 : index
    %c0_4 = arith.constant 0 : index
    %1 = vector.load %arg1[%c0_2, %c0_3, %c0_4] : memref<2x1x1xi32, #tpu.memory_space<vmem>>, vector<2x1x1xi32>
    %2 = tpu.iota {dimensions = array<i32: 2>} : vector<2x1x8xi32>
    %3 = tpu.iota {dimensions = array<i32: 1>} : vector<2x8x1xi32>
    %4 = vector.broadcast %1 : vector<2x1x1xi32> to vector<2x1x8xi32>
    %5 = arith.cmpi slt, %2, %4 : vector<2x1x8xi32>
    %6 = vector.broadcast %1 : vector<2x1x1xi32> to vector<2x8x1xi32>
    %7 = arith.cmpi slt, %3, %6 : vector<2x8x1xi32>
    %c0_5 = arith.constant 0 : index
    %c0_6 = arith.constant 0 : index
    %8 = vector.load %arg3[%c0_5, %c0_6] : memref<16x96xf32, #tpu.memory_space<vmem>>, vector<16x96xf32>
    %c0_7 = arith.constant 0 : index
    %c0_8 = arith.constant 0 : index
    %9 = vector.load %arg4[%c0_7, %c0_8] : memref<1x96xf32, #tpu.memory_space<vmem>>, vector<1x96xf32>
    %10 = vector.shape_cast %0 : vector<2x8x16xf32> to vector<16x16xf32>
    %cst = arith.constant dense<0.000000e+00> : vector<16x96xf32>
    %11 = tpu.matmul %10, %8, %cst {dimension_numbers = #tpu.dot_dimension_numbers<[1], [0], [0], [1], [0, 0, 1, 1], [], []>} : vector<16x16xf32>, vector<16x96xf32>, vector<16x96xf32> -> vector<16x96xf32>
    %12 = vector.broadcast %9 : vector<1x96xf32> to vector<16x96xf32>
    %13 = arith.addf %11, %12 : vector<16x96xf32>
    %14 = vector.shape_cast %13 : vector<16x96xf32> to vector<2x8x96xf32>
    %15 = vector.extract_strided_slice %14 {offsets = [0, 0, 0], sizes = [2, 8, 32], strides = [1, 1, 1]} : vector<2x8x96xf32> to vector<2x8x32xf32>
    %16 = vector.extract_strided_slice %14 {offsets = [0, 0, 32], sizes = [2, 8, 32], strides = [1, 1, 1]} : vector<2x8x96xf32> to vector<2x8x32xf32>
    %17 = vector.extract_strided_slice %14 {offsets = [0, 0, 64], sizes = [2, 8, 32], strides = [1, 1, 1]} : vector<2x8x96xf32> to vector<2x8x32xf32>
    "tpu.trace_start"() <{level = 10 : i32, message = "bnd,bmd->bnm"}> : () -> ()
    %cst_9 = arith.constant dense<0.000000e+00> : vector<2x8x8xf32>
    %18 = tpu.matmul %15, %16, %cst_9 {dimension_numbers = #tpu.dot_dimension_numbers<[2], [2], [1], [1], [0, 0, 0, 1, 1, 1], [0], [0]>} : vector<2x8x32xf32>, vector<2x8x32xf32>, vector<2x8x8xf32> -> vector<2x8x8xf32>
    %cst_10 = arith.constant -9.99999995E+11 : f32
    "tpu.trace_stop"() : () -> ()
    %19 = vector.shape_cast %5 : vector<2x1x8xi1> to vector<2x1x8xi1>
    %20 = vector.broadcast %19 : vector<2x1x8xi1> to vector<2x8x8xi1>
    %21 = vector.broadcast %cst_10 : f32 to vector<2x8x8xf32>
    %22 = arith.select %20, %18, %21 : vector<2x8x8xi1>, vector<2x8x8xf32>
    %cst_11 = arith.constant dense<0xFF800000> : vector<2x8xf32>
    %23 = vector.multi_reduction <maximumf>, %22, %cst_11 [2] : vector<2x8x8xf32> to vector<2x8xf32>
    %24 = vector.shape_cast %23 : vector<2x8xf32> to vector<2x8x1xf32>
    %25 = vector.broadcast %24 : vector<2x8x1xf32> to vector<2x8x8xf32>
    %26 = arith.subf %22, %25 : vector<2x8x8xf32>
    %27 = math.exp %26 : vector<2x8x8xf32>
    %cst_12 = arith.constant dense<0.000000e+00> : vector<2x8xf32>
    %28 = vector.multi_reduction <add>, %27, %cst_12 [2] : vector<2x8x8xf32> to vector<2x8xf32>
    %29 = vector.shape_cast %28 : vector<2x8xf32> to vector<2x8x1xf32>
    %30 = tpu.reciprocal %29 : vector<2x8x1xf32> -> vector<2x8x1xf32>
    %31 = vector.broadcast %30 : vector<2x8x1xf32> to vector<2x8x8xf32>
    %32 = arith.mulf %27, %31 : vector<2x8x8xf32>
    %cst_13 = arith.constant 0.000000e+00 : f32
    %33 = vector.shape_cast %7 : vector<2x8x1xi1> to vector<2x8x1xi1>
    %34 = vector.broadcast %33 : vector<2x8x1xi1> to vector<2x8x8xi1>
    %35 = vector.broadcast %cst_13 : f32 to vector<2x8x8xf32>
    %36 = arith.select %34, %32, %35 : vector<2x8x8xi1>, vector<2x8x8xf32>
    "tpu.trace_start"() <{level = 10 : i32, message = "bnm,bmd->bnd"}> : () -> ()
    %cst_14 = arith.constant dense<0.000000e+00> : vector<2x8x32xf32>
    %37 = tpu.matmul %36, %17, %cst_14 {dimension_numbers = #tpu.dot_dimension_numbers<[2], [1], [1], [2], [0, 0, 0, 1, 1, 2], [0], [0]>} : vector<2x8x8xf32>, vector<2x8x32xf32>, vector<2x8x32xf32> -> vector<2x8x32xf32>
    "tpu.trace_stop"() : () -> ()
    %c0_15 = arith.constant 0 : index
    %c0_16 = arith.constant 0 : index
    %38 = vector.load %arg5[%c0_15, %c0_16] : memref<32x96xf32, #tpu.memory_space<vmem>>, vector<32x96xf32>
    %c0_17 = arith.constant 0 : index
    %c0_18 = arith.constant 0 : index
    %39 = vector.load %arg6[%c0_17, %c0_18] : memref<1x96xf32, #tpu.memory_space<vmem>>, vector<1x96xf32>
    %40 = vector.shape_cast %37 : vector<2x8x32xf32> to vector<16x32xf32>
    %cst_19 = arith.constant dense<0.000000e+00> : vector<16x96xf32>
    %41 = tpu.matmul %40, %38, %cst_19 {dimension_numbers = #tpu.dot_dimension_numbers<[1], [0], [0], [1], [0, 0, 1, 1], [], []>} : vector<16x32xf32>, vector<32x96xf32>, vector<16x96xf32> -> vector<16x96xf32>
    %42 = vector.broadcast %39 : vector<1x96xf32> to vector<16x96xf32>
    %43 = arith.addf %41, %42 : vector<16x96xf32>
    %44 = vector.shape_cast %43 : vector<16x96xf32> to vector<2x8x96xf32>
    %45 = vector.extract_strided_slice %44 {offsets = [0, 0, 0], sizes = [2, 8, 32], strides = [1, 1, 1]} : vector<2x8x96xf32> to vector<2x8x32xf32>
    %46 = vector.extract_strided_slice %44 {offsets = [0, 0, 32], sizes = [2, 8, 32], strides = [1, 1, 1]} : vector<2x8x96xf32> to vector<2x8x32xf32>
    %47 = vector.extract_strided_slice %44 {offsets = [0, 0, 64], sizes = [2, 8, 32], strides = [1, 1, 1]} : vector<2x8x96xf32> to vector<2x8x32xf32>
    "tpu.trace_start"() <{level = 10 : i32, message = "bnd,bmd->bnm"}> : () -> ()
    %cst_20 = arith.constant dense<0.000000e+00> : vector<2x8x8xf32>
    %48 = tpu.matmul %45, %46, %cst_20 {dimension_numbers = #tpu.dot_dimension_numbers<[2], [2], [1], [1], [0, 0, 0, 1, 1, 1], [0], [0]>} : vector<2x8x32xf32>, vector<2x8x32xf32>, vector<2x8x8xf32> -> vector<2x8x8xf32>
    %cst_21 = arith.constant -9.99999995E+11 : f32
    "tpu.trace_stop"() : () -> ()
    %49 = vector.shape_cast %5 : vector<2x1x8xi1> to vector<2x1x8xi1>
    %50 = vector.broadcast %49 : vector<2x1x8xi1> to vector<2x8x8xi1>
    %51 = vector.broadcast %cst_21 : f32 to vector<2x8x8xf32>
    %52 = arith.select %50, %48, %51 : vector<2x8x8xi1>, vector<2x8x8xf32>
    %cst_22 = arith.constant dense<0xFF800000> : vector<2x8xf32>
    %53 = vector.multi_reduction <maximumf>, %52, %cst_22 [2] : vector<2x8x8xf32> to vector<2x8xf32>
    %54 = vector.shape_cast %53 : vector<2x8xf32> to vector<2x8x1xf32>
    %55 = vector.broadcast %54 : vector<2x8x1xf32> to vector<2x8x8xf32>
    %56 = arith.subf %52, %55 : vector<2x8x8xf32>
    %57 = math.exp %56 : vector<2x8x8xf32>
    %cst_23 = arith.constant dense<0.000000e+00> : vector<2x8xf32>
    %58 = vector.multi_reduction <add>, %57, %cst_23 [2] : vector<2x8x8xf32> to vector<2x8xf32>
    %59 = vector.shape_cast %58 : vector<2x8xf32> to vector<2x8x1xf32>
    %60 = tpu.reciprocal %59 : vector<2x8x1xf32> -> vector<2x8x1xf32>
    %61 = vector.broadcast %60 : vector<2x8x1xf32> to vector<2x8x8xf32>
    %62 = arith.mulf %57, %61 : vector<2x8x8xf32>
    %cst_24 = arith.constant 0.000000e+00 : f32
    %63 = vector.shape_cast %7 : vector<2x8x1xi1> to vector<2x8x1xi1>
    %64 = vector.broadcast %63 : vector<2x8x1xi1> to vector<2x8x8xi1>
    %65 = vector.broadcast %cst_24 : f32 to vector<2x8x8xf32>
    %66 = arith.select %64, %62, %65 : vector<2x8x8xi1>, vector<2x8x8xf32>
    "tpu.trace_start"() <{level = 10 : i32, message = "bnm,bmd->bnd"}> : () -> ()
    %cst_25 = arith.constant dense<0.000000e+00> : vector<2x8x32xf32>
    %67 = tpu.matmul %66, %47, %cst_25 {dimension_numbers = #tpu.dot_dimension_numbers<[2], [1], [1], [2], [0, 0, 0, 1, 1, 2], [0], [0]>} : vector<2x8x8xf32>, vector<2x8x32xf32>, vector<2x8x32xf32> -> vector<2x8x32xf32>
    "tpu.trace_stop"() : () -> ()
    %c0_26 = arith.constant 0 : index
    %c0_27 = arith.constant 0 : index
    %c0_28 = arith.constant 0 : index
    %68 = vector.load %arg7[%c0_26, %c0_27, %c0_28] : memref<2x8x32xf32, #tpu.memory_space<vmem>>, vector<2x8x32xf32>
    tpu.vector_store %arg7[%c0_26, %c0_27, %c0_28], %67 {strides = array<i32>} : memref<2x8x32xf32, #tpu.memory_space<vmem>>, vector<2x8x32xf32>,
    return
  }
  func.func @transform_0(%arg0: i32) -> (i32, i32, i32) {
    %c0_i32 = arith.constant 0 : i32
    %c0_i32_0 = arith.constant 0 : i32
    %c0_i32_1 = arith.constant 0 : i32
    return %arg0, %c0_i32, %c0_i32_0 : i32, i32, i32
  }
  func.func @transform_1(%arg0: i32) -> (i32, i32, i32) {
    %c0_i32 = arith.constant 0 : i32
    %c0_i32_0 = arith.constant 0 : i32
    %c0_i32_1 = arith.constant 0 : i32
    return %arg0, %c0_i32, %c0_i32_0 : i32, i32, i32
  }
  func.func @transform_2(%arg0: i32) -> (i32, i32) {
    %c0_i32 = arith.constant 0 : i32
    %c0_i32_0 = arith.constant 0 : i32
    %c0_i32_1 = arith.constant 0 : i32
    return %c0_i32, %c0_i32_0 : i32, i32
  }
  func.func @transform_3(%arg0: i32) -> (i32, i32) {
    %c0_i32 = arith.constant 0 : i32
    %c0_i32_0 = arith.constant 0 : i32
    %c0_i32_1 = arith.constant 0 : i32
    return %c0_i32, %c0_i32_0 : i32, i32
  }
  func.func @transform_4(%arg0: i32) -> (i32, i32) {
    %c0_i32 = arith.constant 0 : i32
    %c0_i32_0 = arith.constant 0 : i32
    %c0_i32_1 = arith.constant 0 : i32
    return %c0_i32, %c0_i32_0 : i32, i32
  }
  func.func @transform_5(%arg0: i32) -> (i32, i32) {
    %c0_i32 = arith.constant 0 : i32
    %c0_i32_0 = arith.constant 0 : i32
    %c0_i32_1 = arith.constant 0 : i32
    return %c0_i32, %c0_i32_0 : i32, i32
  }
  func.func @transform_6(%arg0: i32) -> (i32, i32, i32) {
    %c0_i32 = arith.constant 0 : i32
    %c0_i32_0 = arith.constant 0 : i32
    %c0_i32_1 = arith.constant 0 : i32
    return %arg0, %c0_i32, %c0_i32_0 : i32, i32, i32
  }
}

</mosaic_0001>

<bundles_post_ra>
// kernel: tpu_custom_call.1
= control target key start
LH: loop header
LB: loop body
LE: loop exit
PB: predicated region body
PF: predicated region fallthrough
CT: control target
= control target key end

     0   :  { %11 = vsyncpa [#allocation3], 0  ;;  %s1438_s0 = inlined_call_operand.vmem [shape: s32[2,1,1], index: 0, kind: input, shape index: {}]   ;;  %s1439_s1 = inlined_call_operand.hbm [shape: f32[2,8,16], index: 1, kind: input, shape index: {}]   ;;  %s1440_s2 = inlined_call_operand.hbm [shape: f32[16,96], index: 2, kind: input, shape index: {}]   ;;  %s1441_s3 = inlined_call_operand.vmem [shape: f32[1,96], index: 3, kind: input, shape index: {}]   ;;  %s1442_s4 = inlined_call_operand.hbm [shape: f32[32,96], index: 4, kind: input, shape index: {}]   ;;  %s1443_s5 = inlined_call_operand.vmem [shape: f32[1,96], index: 5, kind: input, shape index: {}]   ;;  %s1444_s6 = inlined_call_operand.hbm [shape: f32[2,8,32], index: 6, kind: output, shape index: {}]  }
   0x1   :  { %12 = vsyncpa [#allocation6], 0 }
   0x2   :  { %13 = vsyncpa [#allocation4], 0  ;;  %s1219_s21 = smov [#allocation5]   ;;  %s1220_s23 = smov [#allocation2]  }
   0x3   :  { %s33_s22 = sshll.u32 %s1219_s21, 4  ;;  %s21_s24 = sshll.u32 %s1220_s23, 4  ;;  %s34_s22 = int_to_ptr.vmem [resolvable:$true] %s33_s22  ;;  %s1265_s24 = int_to_ptr.vmem [resolvable:$true] %s21_s24 }
   0x4   :  { %s1125_s27 = scalar_lea.hbm %s1440_s2, 256 }
   0x5   :  { %p1126_p0 = scmp.ne.s32.totalorder %s1440_s2, %s1125_s27  ;;  %p1129_p1 = scmp.lt.u32.totalorder %s1125_s27, %s1440_s2 }
   0x7   :  { %p1131_p2 = pnand %p1129_p1, %p1126_p0 }
   0x9   :  { %1134 = shalt.err (!%p1131_p2)
}
   0xa   :  { %s1135_s8 = scalar_lea.vmem %s34_s22, 256  ;;  %p1140_p4 = scmp.lt.s32.totalorder %s34_s22, %s34_s22 }
   0xb   :  { %p1136_p3 = scmp.ne.s32.totalorder %s34_s22, %s1135_s8  ;;  %p1141_p5 = scmp.lt.s32.totalorder %s1135_s8, %s1135_s8 }
   0xd   :  { %p1142_p6 = por %p1141_p5, %p1140_p4 }
   0xf   :  { %p1143_p7 = pnand %p1142_p6, %p1136_p3 }
  0x11   :  { %1146 = shalt.err (!%p1143_p7)
}
  0x12   :  { %s1221_s9 = smov 128   ;;  %s1222_s10 = smov 8  }
  0x13   :  { %39 = dma.hbm_to_vmem [thread:$0]  %s1440_s2, 256, %s34_s22, [#allocation6], %s1221_s9, %s1221_s9, %s1222_s10  }
  0x14   :  { %s1147_s15 = scalar_lea.hbm %s1439_s1, 256 }
  0x15   :  { %p1148_p8 = scmp.ne.s32.totalorder %s1439_s1, %s1147_s15  ;;  %p1151_p9 = scmp.lt.u32.totalorder %s1147_s15, %s1439_s1 }
  0x17   :  { %p1153_p10 = pnand %p1151_p9, %p1148_p8 }
  0x19   :  { %1156 = shalt.err (!%p1153_p10)
}
  0x1a   :  { %s1157_s20 = scalar_lea.vmem %s1265_s24, 256  ;;  %p1162_p12 = scmp.lt.s32.totalorder %s1265_s24, %s1265_s24 }
  0x1b   :  { %p1158_p11 = scmp.ne.s32.totalorder %s1265_s24, %s1157_s20  ;;  %p1163_p13 = scmp.lt.s32.totalorder %s1157_s20, %s1157_s20 }
  0x1d   :  { %p1164_p0 = por %p1163_p13, %p1162_p12 }
  0x1f   :  { %p1165_p1 = pnand %p1164_p0, %p1158_p11 }
  0x21   :  { %1168 = shalt.err (!%p1165_p1)
}
  0x22   :  { %27 = dma.hbm_to_vmem [thread:$0]  %s1439_s1, 256, %s1265_s24, [#allocation3], %s1221_s9, %s1221_s9, %s1222_s10  }
  0x23   :  { %s1223_s22 = smov [#allocation7]   ;;  %s1169_s27 = scalar_lea.hbm %s1442_s4, 512 }
  0x24   :  { %s47_s23 = sshll.u32 %s1223_s22, 4  ;;  %p1170_p2 = scmp.ne.s32.totalorder %s1442_s4, %s1169_s27  ;;  %s48_s23 = int_to_ptr.vmem [resolvable:$true] %s47_s23 }
  0x25   :  { %p1173_p3 = scmp.lt.u32.totalorder %s1169_s27, %s1442_s4 }
  0x27   :  { %p1175_p4 = pnand %p1173_p3, %p1170_p2 }
  0x29   :  { %1178 = shalt.err (!%p1175_p4)
}
  0x2a   :  { %s1179_s8 = scalar_lea.vmem %s48_s23, 512  ;;  %p1184_p6 = scmp.lt.s32.totalorder %s48_s23, %s48_s23 }
  0x2b   :  { %p1180_p5 = scmp.ne.s32.totalorder %s48_s23, %s1179_s8  ;;  %p1185_p7 = scmp.lt.s32.totalorder %s1179_s8, %s1179_s8 }
  0x2d   :  { %p1186_p8 = por %p1185_p7, %p1184_p6 }
  0x2f   :  { %p1187_p9 = pnand %p1186_p8, %p1180_p5 }
  0x31   :  { %1190 = shalt.err (!%p1187_p9)
}
  0x32   :  { %53 = dma.hbm_to_vmem [thread:$0]  %s1442_s4, 512, %s48_s23, [#allocation6], %s1221_s9, %s1221_s9, %s1222_s10  }
  0x33   :  { %1213 = dma.done.wait [#allocation3], 256  }
  0x34   :  { %1214 = vsyncadd [#allocation3], 4294967040 }
  0x35   :  { %1215 = dma.done.wait [#allocation6], 768  }
  0x36   :  { %1216 = vsyncadd [#allocation6], 4294966528  ;;  %vm108_vm0 = vcmask 130048   ;;  %v99_v0 = vld [vmem:[#allocation5] sm:$0xff]  ;;  %v100_v1 = vld [vmem:[#allocation5 + $0x8] sm:$0xff]  ;;  %v1224_v5 = vmov 0.0   ;;  %v69_v16 = vlaneseq }
  0x37   :  { %v65_v2 = vld [vmem:[#allocation2] sm:$0xff]  ;;  %v1084_v3 = vpack.c.bf16 %v100_v1, %v99_v0  ;;  %v66_v4 = vld [vmem:[#allocation2 + $0x8] sm:$0xff]  ;;  %1033 = vmatprep.subr.mxu1 %v1224_v5  ;;  %vm1225_vm1 = vmmov 0   ;;  %v1226_v8 = vmov 0   ;;  %s1227_s16 = smov 96   ;;  %vm193_vm2 = vcmask 261120  }
  0x38   :  { %1030 = vmatprep.mubr.msk.f32.mxu0 %vm108_vm0, %v65_v2  ;;  %1035 = vmatprep.mubr.msk.f32.mxu1 %vm1225_vm1, %v1224_v5  ;;  %v67_v6 = vld [vmem:[%s1438_s0] sm:$0x1]  ;;  %v1334_v11 = vld [vmem:[%s1438_s0 + $0x1] sm:$0x1]  ;;  %v72_v17 = vshrl.u32 %v69_v16, 7  ;;  %v70_v21 = vand.u32 127, %v69_v16 }
  0x39   :  { %1085 = vmatprep.subr.bf16.mxu0 %v1084_v3  ;;  %v982_v7 = vld [vmem:[%s1441_s3] ss:$0 sm:$0xff]  ;;  %1107 = vset.pattern.permute.xlu1 %v1226_v8  ;;  %vm351_vm4 = vcmask 64512   ;;  %s1228_s0 = smov 64   ;;  %v539_v52 = vld [vmem:[#allocation7 + $0x8] sm:$0xff]  ;;  %v540_v63 = vld [vmem:[#allocation7 + $0x10] sm:$0xff] }
  0x3a   :  { %1087 = vmatpush3.bf16.msra.mxu0 %v1084_v3  ;;  %1108 = vset.pattern.permute.xlu0 %v1226_v8  ;;  %v78_v18 = vsub.s32 0, %v72_v17  ;;  %v538_v51 = vld [vmem:[#allocation7] sm:$0xff]  ;;  %v541_v0 = vld [vmem:[#allocation7 + $0x18] sm:$0xff] }
  0x3b   :  { %1038 = vmatprep.subr.mxu0 %v1224_v5  ;;  %74 = vperm.xlu1 %1107, %v67_v6   ;;  %v1088_v53 = vpack.c.bf16 %v539_v52, %v538_v51  ;;  %v1092_v1 = vpack.c.bf16 %v541_v0, %v540_v63 }
  0x3c   :  { %v92_v34 = vrot.slane %v67_v6, %v78_v18  ;;  %v96_v49 = vrot.slane %v1334_v11, %v78_v18 }
  0x3d   :  { %1031 = vmatmul.mubr.msk.f32.vlgmr.msra.gmra.mrb[0].mxu0 %vm108_vm0, %v66_v4 }
  0x3e   :  { %1040 = vmatprep.mubr.msk.f32.mxu0 %vm1225_vm1, %v1224_v5  ;;  %vm97_vm6 = vcmp.lt.s32.totalorder %v72_v17, %v92_v34  ;;  %vm98_vm7 = vcmp.lt.s32.totalorder %v72_v17, %v96_v49 }
  0x3f   :  { %81 = vperm.xlu1 %1107, %v1334_v11   ;;  %v374_v35 = vsel %vm97_vm6, 1, %v1226_v8  ;;  %v375_v50 = vsel %vm98_vm7, 1, %v1226_v8 }
  0xba   :  { %v75_v19 = vpop.permute.xlu1 %74 }
  0xbb   :  { %v79_v20 = vrot.slane %v75_v19, %v78_v18 }
  0xbd   :  { %vm1349_vm3 = vcmp.lt.s32.totalorder %v70_v21, %v79_v20 }
  0xbe   :  { %v82_v22 = vpop.permute.xlu1 %81 }
  0xbf   :  { %v86_v24 = vrot.slane %v82_v22, %v78_v18 }
  0xc1   :  { %vm1356_vm5 = vcmp.lt.s32.totalorder %v70_v21, %v86_v24 }
 0x110   :  { %v1032_v9 = vpop.f32.mrb[0].mxu0 }
 0x111   :  { %v181_v10 = vpop.f32.mrb[1].mxu0  ;;  %v187_v13 = vadd.f32 %v1032_v9, %v982_v7 }
 0x112   :  { %v182_v12 = vadd.f32 %v982_v7, %v181_v10  ;;  %v991_v7 = vld [vmem:[%s1443_s5] ss:$0 sm:$0xff]  ;;  %s1229_s5 = smov [#allocation8]  }
 0x113   :  { %s969_s18 = sshll.u32 %s1229_s5, 4  ;;  %s970_s18 = int_to_ptr.vmem [resolvable:$true] %s969_s18 }
 0x114   :  { %191 = vrot.lane.b32.xlu0 %v182_v12, %s1227_s16  ;;  %s1191_s19 = scalar_lea.vmem %s970_s18, 256  ;;  %p1196_p11 = scmp.lt.s32.totalorder %s970_s18, %s970_s18 }
 0x115   :  { %p1192_p10 = scmp.ne.s32.totalorder %s970_s18, %s1191_s19  ;;  %p1197_p12 = scmp.lt.s32.totalorder %s1191_s19, %s1191_s19 }
 0x117   :  { %p1198_p13 = por %p1197_p12, %p1196_p11 }
 0x118   :  { %269 = vrot.lane.b32.xlu0 %v187_v13, %s1227_s16 }
 0x119   :  { %p1199_p0 = pnand %p1198_p13, %p1192_p10 }
 0x186   :  { %v192_v14 = vpop.permute.xlu0 %191 }
 0x187   :  { %1034 = vmatpush3.xpose.msk.msra.mxu1 %vm193_vm2, %v192_v14 }
 0x188   :  { %1043 = vmatprep.subr.mxu1 %v1224_v5 }
 0x18a   :  { %1036 = vmatmul.mubr.msk.f32.vlgmr.msra.gmra.mrb[0].mxu1 %vm193_vm2, %v182_v12  ;;  %v270_v15 = vpop.permute.xlu0 %269 }
 0x18b   :  { %1039 = vmatpush3.xpose.msk.msra.mxu0 %vm193_vm2, %v270_v15  ;;  %1045 = vmatprep.mubr.msk.f32.mxu1 %vm1225_vm1, %v1224_v5 }
 0x18c   :  { %1048 = vmatprep.subr.mxu0 %v1224_v5 }
 0x18e   :  { %1041 = vmatmul.mubr.msk.f32.vlgmr.msra.gmra.mrb[2].mxu0 %vm193_vm2, %v187_v13 }
 0x18f   :  { %1050 = vmatprep.mubr.msk.f32.mxu0 %vm1225_vm1, %v1224_v5 }
 0x25d   :  { %v264_v25 = vpop.f32.mrb[0].mxu1 }
 0x25e   :  { %v349_v26 = vsel %vm1349_vm3, %v264_v25, -1e+12  ;;  %v1037_v27 = vpop.f32.mrb[1].mxu1 }
 0x25f   :  { %v352_v28 = vsel %vm351_vm4, %v349_v26, -inf }
 0x260   :  { %353 = vmax.xlane.f32.xlu0 %v352_v28 }
 0x261   :  { %v341_v30 = vpop.f32.mrb[2].mxu0 }
 0x262   :  { %v350_v31 = vsel %vm1356_vm5, %v341_v30, -1e+12  ;;  %v1042_v32 = vpop.f32.mrb[3].mxu0 }
 0x263   :  { %v355_v33 = vsel %vm351_vm4, %v350_v31, -inf }
 0x264   :  { %356 = vmax.xlane.f32.xlu1 %v355_v33 }
 0x275   :  { %377 = vperm.xlu1 %1107, %v374_v35  }
 0x279   :  { %386 = vrot.lane.b32.xlu1 %v182_v12, %s1228_s0 }
 0x27d   :  { %462 = vrot.lane.b32.xlu1 %v187_v13, %s1228_s0 }
 0x2ed   :  { %v354_v36 = vpop.xlane.xlu0 %353 }
 0x2ee   :  { %v358_v37 = vsub.f32 %v349_v26, %v354_v36 }
 0x2f0   :  { %v360_v40 = vmul.f32 1.442695, %v358_v37 }
 0x2f1   :  { %v357_v38 = vpop.xlane.xlu1 %356 }
 0x2f2   :  { %v359_v39 = vsub.f32 %v350_v31, %v357_v38 }
 0x2f4   :  { %v362_v41 = vmul.f32 1.442695, %v359_v39 }
 0x2f5   :  { %v1366_v42 = vpop.permute.xlu1 %377 }
 0x2f6   :  { %1109 = vpow2.f32 %v362_v41  ;;  %vm382_vm9 = vcmp.eq.s32.totalorder %v1366_v42, 1 }
 0x2f7   :  { %1111 = vpow2.f32 %v360_v40 }
 0x2f9   :  { %v387_v43 = vpop.permute.xlu1 %386 }
 0x2fa   :  { %1044 = vmatpush3.msra.mxu1 %v387_v43 }
 0x2fb   :  { %1089 = vmatprep.subr.bf16.mxu1 %v1088_v53 }
 0x2fd   :  { %v463_v44 = vpop.permute.xlu1 %462 }
 0x2fe   :  { %1049 = vmatpush3.msra.mxu0 %v463_v44 }
 0x2ff   :  { %1064 = vmatprep.subr.mxu0 %v1224_v5 }
 0x300   :  { %v1110_v45 = vpop.eup %1109 }
 0x301   :  { %v367_v46 = vsel %vm351_vm4, %v1110_v45, 0.0  ;;  %v1112_v47 = vpop.eup %1111 }
 0x302   :  { %368 = vadd.xlane.f32.xlu0 %v367_v46  ;;  %v364_v48 = vsel %vm351_vm4, %v1112_v47, 0.0 }
 0x306   :  { %365 = vadd.xlane.f32.xlu0 %v364_v48 }
 0x31c   :  { %380 = vperm.xlu0 %1108, %v375_v50  }
 0x38f   :  { %v369_v54 = vpop.xlane.xlu0 %368 }
 0x390   :  { %1113 = vrcp.f32 %v369_v54 }
 0x393   :  { %v366_v55 = vpop.xlane.xlu0 %365 }
 0x394   :  { %1115 = vrcp.f32 %v366_v55 }
 0x39a   :  { %v1114_v56 = vpop.eup %1113 }
 0x39b   :  { %v373_v57 = vmul.f32 %v1114_v56, %v1110_v45  ;;  %v1373_v58 = vpop.permute.xlu0 %380 }
 0x39c   :  { %vm383_vm8 = vcmp.eq.s32.totalorder %v1373_v58, 1 }
 0x39d   :  { %v385_v59 = vsel %vm383_vm8, %v373_v57, 0.0 }
 0x39e   :  { %v1116_v60 = vpop.eup %1115  ;;  %1051 = vmatmul.mubr.msk.f32.vlgmr.msra.gmra.mrb[4].mxu0 %vm351_vm4, %v385_v59 }
 0x39f   :  { %v372_v61 = vmul.f32 %v1116_v60, %v1112_v47  ;;  %1066 = vmatprep.mubr.msk.f32.mxu0 %vm1225_vm1, %v1224_v5 }
 0x3a1   :  { %v384_v62 = vsel %vm382_vm9, %v372_v61, 0.0 }
 0x3a2   :  { %1046 = vmatmul.mubr.msk.f32.vlgmr.msra.gmra.mrb[2].mxu1 %vm351_vm4, %v384_v62 }
 0x3a3   :  { %1091 = vmatpush3.bf16.msra.mxu1 %v1088_v53 }
 0x3a4   :  { %1093 = vmatprep.subr.bf16.mxu1 %v1092_v1 }
 0x3a7   :  { %1095 = vmatpush3.bf16.msra.mxu1 %v1092_v1 }
 0x3a8   :  { %1074 = vmatprep.subr.mxu1 %v1224_v5 }
 0x471   :  { %v534_v2 = vpop.f32.mrb[4].mxu0 }
 0x472   :  { %v1052_v3 = vpop.f32.mrb[5].mxu0 }
 0x475   :  { %v458_v4 = vpop.f32.mrb[2].mxu1 }
 0x476   :  { %v1047_v6 = vpop.f32.mrb[3].mxu1  ;;  %1061 = vmatprep.mubr.msk.f32.mxu1 %vm193_vm2, %v458_v4 }
 0x477   :  { %1062 = vmatmul.mubr.msk.f32.vlgmr.msra.gmra.mrb[4].mxu1 %vm193_vm2, %v534_v2 }
 0x478   :  { %1076 = vmatprep.mubr.msk.f32.mxu1 %vm1225_vm1, %v1224_v5 }
 0x54a   :  { %v1063_v8 = vpop.f32.mrb[4].mxu1 }
 0x54b   :  { %v621_v9 = vpop.f32.mrb[5].mxu1  ;;  %v627_v11 = vadd.f32 %v1063_v8, %v991_v7 }
 0x54c   :  { %v622_v10 = vadd.f32 %v991_v7, %v621_v9 }
 0x54e   :  { %631 = vrot.lane.b32.xlu1 %v622_v10, %s1227_s16 }
 0x552   :  { %708 = vrot.lane.b32.xlu1 %v627_v11, %s1227_s16 }
 0x5c0   :  { %v632_v12 = vpop.permute.xlu1 %631 }
 0x5c1   :  { %1065 = vmatpush3.xpose.msk.msra.mxu0 %vm193_vm2, %v632_v12 }
 0x5c2   :  { %1069 = vmatprep.subr.mxu0 %v1224_v5 }
 0x5c4   :  { %1067 = vmatmul.mubr.msk.f32.vlgmr.msra.gmra.mrb[6].mxu0 %vm193_vm2, %v622_v10  ;;  %v709_v13 = vpop.permute.xlu1 %708 }
 0x5c5   :  { %1070 = vmatpush3.xpose.msk.msra.mxu0 %vm193_vm2, %v709_v13  ;;  %1071 = vmatprep.mubr.msk.f32.mxu0 %vm1225_vm1, %v1224_v5 }
 0x5c6   :  { %1079 = vmatprep.subr.mxu0 %v1224_v5 }
 0x5c8   :  { %1072 = vmatmul.mubr.msk.f32.vlgmr.msra.gmra.mrb[8].mxu0 %vm193_vm2, %v627_v11 }
 0x5c9   :  { %1081 = vmatprep.mubr.msk.f32.mxu0 %vm1225_vm1, %v1224_v5 }
 0x697   :  { %v703_v14 = vpop.f32.mrb[6].mxu0 }
 0x698   :  { %v784_v15 = vsel %vm1349_vm3, %v703_v14, -1e+12  ;;  %v1068_v16 = vpop.f32.mrb[7].mxu0 }
 0x699   :  { %v786_v17 = vsel %vm351_vm4, %v784_v15, -inf }
 0x69a   :  { %787 = vmax.xlane.f32.xlu1 %v786_v17 }
 0x69b   :  { %v780_v18 = vpop.f32.mrb[8].mxu0 }
 0x69c   :  { %v785_v19 = vsel %vm1356_vm5, %v780_v18, -1e+12  ;;  %v1073_v20 = vpop.f32.mrb[9].mxu0 }
 0x69d   :  { %v789_v21 = vsel %vm351_vm4, %v785_v19, -inf }
 0x69e   :  { %790 = vmax.xlane.f32.xlu0 %v789_v21 }
 0x6b4   :  { %886 = vrot.lane.b32.xlu0 %v627_v11, %s1228_s0 }
 0x727   :  { %v788_v22 = vpop.xlane.xlu1 %787 }
 0x728   :  { %v792_v5 = vsub.f32 %v784_v15, %v788_v22 }
 0x72a   :  { %v794_v24 = vmul.f32 1.442695, %v792_v5 }
 0x72b   :  { %v791_v25 = vpop.xlane.xlu0 %790 }
 0x72c   :  { %1117 = vpow2.f32 %v794_v24  ;;  %v793_v23 = vsub.f32 %v785_v19, %v791_v25 }
 0x72e   :  { %v796_v26 = vmul.f32 1.442695, %v793_v23 }
 0x72f   :  { %v887_v27 = vpop.permute.xlu0 %886 }
 0x730   :  { %1119 = vpow2.f32 %v796_v26  ;;  %1080 = vmatpush3.msra.mxu0 %v887_v27 }
 0x736   :  { %v1118_v28 = vpop.eup %1117 }
 0x737   :  { %v798_v29 = vsel %vm351_vm4, %v1118_v28, 0.0 }
 0x738   :  { %799 = vadd.xlane.f32.xlu1 %v798_v29 }
 0x73a   :  { %v1120_v30 = vpop.eup %1119 }
 0x73b   :  { %v801_v31 = vsel %vm351_vm4, %v1120_v30, 0.0 }
 0x73c   :  { %802 = vadd.xlane.f32.xlu1 %v801_v31 }
 0x74d   :  { %810 = vrot.lane.b32.xlu1 %v622_v10, %s1228_s0 }
 0x7c5   :  { %v800_v32 = vpop.xlane.xlu1 %799 }
 0x7c6   :  { %1121 = vrcp.f32 %v800_v32 }
 0x7c9   :  { %v803_v33 = vpop.xlane.xlu1 %802 }
 0x7ca   :  { %1123 = vrcp.f32 %v803_v33 }
 0x7cd   :  { %v811_v34 = vpop.permute.xlu1 %810 }
 0x7ce   :  { %1075 = vmatpush3.msra.mxu1 %v811_v34 }
 0x7d0   :  { %v1122_v35 = vpop.eup %1121 }
 0x7d1   :  { %v806_v36 = vmul.f32 %v1122_v35, %v1118_v28 }
 0x7d3   :  { %v808_v37 = vsel %vm382_vm9, %v806_v36, 0.0 }
 0x7d4   :  { %v1124_v38 = vpop.eup %1123  ;;  %1077 = vmatmul.mubr.msk.f32.vlgmr.msra.gmra.mrb[6].mxu1 %vm351_vm4, %v808_v37 }
 0x7d5   :  { %v807_v39 = vmul.f32 %v1124_v38, %v1120_v30 }
 0x7d7   :  { %v809_v40 = vsel %vm383_vm8, %v807_v39, 0.0 }
 0x7d8   :  { %1082 = vmatmul.mubr.msk.f32.vlgmr.msra.gmra.mrb[10].mxu0 %vm351_vm4, %v809_v40 }
 0x8a7   :  { %v882_v41 = vpop.f32.mrb[6].mxu1 }
 0x8a8   :  { %962 = vst.msk [vmem:[#allocation8] sm:$0xff] %vm193_vm2, %v882_v41  ;;  %v1078_v43 = vpop.f32.mrb[7].mxu1 }
 0x8ab   :  { %v958_v44 = vpop.f32.mrb[10].mxu0 }
 0x8ac   :  { %963 = vst.msk [vmem:[#allocation8 + $0x8] sm:$0xff] %vm193_vm2, %v958_v44  ;;  %v1083_v42 = vpop.f32.mrb[11].mxu0 }
 0x8ad   :  { %1202 = shalt.err (!%p1199_p0)
}
 0x8ae   :  { %s1203_s21 = scalar_lea.hbm %s1444_s6, 256 }
 0x8af   :  { %p1204_p1 = scmp.ne.s32.totalorder %s1444_s6, %s1203_s21  ;;  %p1207_p2 = scmp.lt.u32.totalorder %s1203_s21, %s1444_s6 }
 0x8b1   :  { %p1209_p3 = pnand %p1207_p2, %p1204_p1 }
 0x8b3   :  { %1212 = shalt.err (!%p1209_p3)
}
 0x8b4   :  { %975 = dma.vmem_to_hbm [thread:$0]  %s970_s18, 256, %s1444_s6, [#allocation4], %s1221_s9, %s1221_s9, %s1222_s10  }
 0x8b5   :  { %1217 = dma.done.wait [#allocation4], 256  }
 0x8b6   :  { %1218 = vsyncadd [#allocation4], 4294967040 }
 0x8b7   :  { %979 = vsyncpa [#allocation3], 1 }
 0x8b8   :  { %980 = vsyncpa [#allocation6], 1 }
 0x8b9   :  { %981 = vsyncpa [#allocation4], 1 }

</bundles_post_ra>
